<compile_context>
chip_gen: v7x
topology: tpu7x:2x2x1
jax: 0.10.0
libtpu: 0.0.40
codegen_flags: <defaults>
</compile_context>

<pallas_src>
import math

import jax
import jax.numpy as jnp
from jax import lax
from jax.experimental import pallas as pl
from jax.experimental.pallas import tpu as pltpu

# Hyper-parameters (small, consistent with the Encoder constructor)
VOCAB = 50
EMBED = 32
HEADS = 4
HEAD_DIM = EMBED // HEADS
FWD_EXP = 4
HIDDEN = FWD_EXP * EMBED
MAX_LEN = 16
BATCH = 2
SEQ = 8
LN_EPS = 1e-5

assert SEQ & (SEQ - 1) == 0, "SEQ must be a power of two for the shift trick"
SEQ_SHIFT = SEQ.bit_length() - 1

TABLE_ROWS = VOCAB + MAX_LEN          # 66: [word_emb; pos_emb]


def _align8(n):
    return (n + 7) // 8 * 8


# Row layout of the packed (P32_ROWS, EMBED) parameter slab (8-aligned sections).
TABLE_OFF = 0                                   # rows 0..65   : embedding table
TFC_OFF = _align8(TABLE_OFF + TABLE_ROWS)       # rows 72..137 : table @ fc_w
W2_OFF = _align8(TFC_OFF + TABLE_ROWS)          # rows 144..271: w2 (HIDDEN, EMBED)
VEC_OFF = _align8(W2_OFF + HIDDEN)              # rows 272..277: the six vectors
FC_B_ROW = VEC_OFF + 0
LN1_G_ROW = VEC_OFF + 1
LN1_B_ROW = VEC_OFF + 2
B2_ROW = VEC_OFF + 3
LN2_G_ROW = VEC_OFF + 4
LN2_B_ROW = VEC_OFF + 5
P32_ROWS = _align8(VEC_OFF + 6)                 # 280

P128_ROWS = EMBED + 1                           # w1 (32,128) + b1 (1,128)


def _layernorm(v, g, b):
    mu = jnp.mean(v, axis=-1, keepdims=True)
    var = jnp.mean((v - mu) ** 2, axis=-1, keepdims=True)
    return (v - mu) * lax.rsqrt(var + LN_EPS) * g + b


def encoder_kernel(tok_ref, p32_ref, p128_ref, out_ref):
    """Whole forward in one grid-less step over the flattened (BATCH*SEQ, EMBED) slab."""
    ns = out_ref.shape[0]
    f32 = jnp.float32
    hi = lax.Precision.HIGHEST

    # ---- Fused word+position embedding gather as one one-hot MXU matmul ----
    # onehot[i, tok[i]] = 1 (cols 0..VOCAB-1) and onehot[i, VOCAB + i%SEQ] = 1.
    col = lax.broadcasted_iota(jnp.int32, (ns, TABLE_ROWS), 1)
    row = lax.broadcasted_iota(jnp.int32, (ns, TABLE_ROWS), 0)
    tok = tok_ref[...]                                            # (NS, 1) int32
    pos_col = VOCAB + (row & (SEQ - 1))
    onehot = jnp.where((col == tok) | (col == pos_col), f32(1.0), f32(0.0))

    table = p32_ref[TABLE_OFF:TABLE_OFF + TABLE_ROWS, :]          # (66, EMBED)
    table_fc = p32_ref[TFC_OFF:TFC_OFF + TABLE_ROWS, :]           # (66, EMBED)

    x = jnp.dot(onehot, table, preferred_element_type=f32, precision=hi)
    xfc = jnp.dot(onehot, table_fc, preferred_element_type=f32, precision=hi)

    # ---- SelfAttention (reference einsum quirk) ----
    # softmax over k sums to 1 and 'nhqk,nvhd->nqhd' reduces k and v
    # independently, so attention output == per-batch column sum of the values
    # broadcast over q.  With fc_w pre-folded into table_fc:
    #   attn_out = seg @ (emb @ fc_w) + fc_b = seg @ xfc + fc_b.
    ri = lax.broadcasted_iota(jnp.int32, (ns, ns), 0)
    ci = lax.broadcasted_iota(jnp.int32, (ns, ns), 1)
    seg = jnp.where((ri >> SEQ_SHIFT) == (ci >> SEQ_SHIFT), f32(1.0), f32(0.0))

    fc_b = p32_ref[FC_B_ROW:FC_B_ROW + 1, :]
    attn = jnp.dot(seg, xfc, preferred_element_type=f32) + fc_b

    # residual + LayerNorm1 (dropout = identity)
    ln1_g = p32_ref[LN1_G_ROW:LN1_G_ROW + 1, :]
    ln1_b = p32_ref[LN1_B_ROW:LN1_B_ROW + 1, :]
    n1 = _layernorm(x + attn, ln1_g, ln1_b)

    # feed-forward: Linear -> ReLU -> Linear
    w1 = p128_ref[0:EMBED, :]
    b1 = p128_ref[EMBED:EMBED + 1, :]
    h = jnp.maximum(jnp.dot(n1, w1, preferred_element_type=f32) + b1, 0.0)

    w2 = p32_ref[W2_OFF:W2_OFF + HIDDEN, :]
    b2 = p32_ref[B2_ROW:B2_ROW + 1, :]
    ff = jnp.dot(h, w2, preferred_element_type=f32) + b2

    # residual + LayerNorm2 (dropout = identity)
    ln2_g = p32_ref[LN2_G_ROW:LN2_G_ROW + 1, :]
    ln2_b = p32_ref[LN2_B_ROW:LN2_B_ROW + 1, :]
    out_ref[...] = _layernorm(n1 + ff, ln2_g, ln2_b).astype(out_ref.dtype)


@jax.jit
def encoder_forward(token_ids, mask, p32, p128):
    """`mask` is accepted for interface parity with the PyTorch module; the
    reference einsum quirk makes the output independent of it."""
    del mask
    N, S = token_ids.shape
    ns = N * S
    tok2d = token_ids.reshape(ns, 1).astype(jnp.int32)

    vmem_spec = pl.BlockSpec(memory_space=pltpu.MemorySpace.VMEM)
    out_flat = pl.pallas_call(
        encoder_kernel,
        out_shape=jax.ShapeDtypeStruct((ns, EMBED), jnp.float32),
        in_specs=[vmem_spec, vmem_spec, vmem_spec],
        out_specs=vmem_spec,
        # No grid: total footprint is well under 200 KiB, far below VMEM limits
        # on v5e/v6e/v7x; splitting this latency-bound kernel across cores or
        # grid steps would only add overhead at BATCH*SEQ = 16 rows.
    )(tok2d, p32, p128)
    return out_flat.reshape(N, S, EMBED)


def init_params(key):
    ks = jax.random.split(key, 8)

    def lin(k, fan_in, shape):
        return (jax.random.normal(k, shape, jnp.float32) / math.sqrt(fan_in)).astype(jnp.float32)

    # NOTE: SelfAttention's values/keys/queries Linears are unused in forward -> omitted.
    return {
        "word_emb": jax.random.normal(ks[0], (VOCAB, EMBED), jnp.float32),
        "pos_emb": jax.random.normal(ks[1], (MAX_LEN, EMBED), jnp.float32),
        "fc_w": lin(ks[2], EMBED, (EMBED, EMBED)),          # stored (in, out): y = x @ W + b
        "fc_b": lin(ks[7], EMBED, (1, EMBED)),
        "ln1_g": jnp.ones((1, EMBED), jnp.float32),
        "ln1_b": jnp.zeros((1, EMBED), jnp.float32),
        "w1": lin(ks[3], EMBED, (EMBED, HIDDEN)),
        "b1": lin(ks[4], EMBED, (1, HIDDEN)),
        "w2": lin(ks[5], HIDDEN, (HIDDEN, EMBED)),
        "b2": lin(ks[6], HIDDEN, (1, EMBED)),
        "ln2_g": jnp.ones((1, EMBED), jnp.float32),
        "ln2_b": jnp.zeros((1, EMBED), jnp.float32),
    }


def pack_params(params):
    """Build the two packed parameter slabs once at init time (outside jit)."""
    table = jnp.concatenate([params["word_emb"], params["pos_emb"]], axis=0)   # (66, EMBED)
    # Fold fc_w into the table exactly (f32 HIGHEST) so the kernel's attention
    # path is a single dependent matmul.
    table_fc = jnp.dot(table, params["fc_w"], precision=lax.Precision.HIGHEST)

    p32 = jnp.zeros((P32_ROWS, EMBED), jnp.float32)
    p32 = p32.at[TABLE_OFF:TABLE_OFF + TABLE_ROWS].set(table)
    p32 = p32.at[TFC_OFF:TFC_OFF + TABLE_ROWS].set(table_fc)
    p32 = p32.at[W2_OFF:W2_OFF + HIDDEN].set(params["w2"])
    p32 = p32.at[FC_B_ROW].set(params["fc_b"][0])
    p32 = p32.at[LN1_G_ROW].set(params["ln1_g"][0])
    p32 = p32.at[LN1_B_ROW].set(params["ln1_b"][0])
    p32 = p32.at[B2_ROW].set(params["b2"][0])
    p32 = p32.at[LN2_G_ROW].set(params["ln2_g"][0])
    p32 = p32.at[LN2_B_ROW].set(params["ln2_b"][0])

    p128 = jnp.zeros((P128_ROWS, HIDDEN), jnp.float32)
    p128 = p128.at[0:EMBED].set(params["w1"])
    p128 = p128.at[EMBED].set(params["b1"][0])
    return p32, p128


def ref_forward(token_ids, mask, params):
    """Pure-JAX reference mirroring the PyTorch forward (full softmax path)."""
    N, S = token_ids.shape
    emb = params["word_emb"][token_ids] + params["pos_emb"][jnp.arange(S)][None]
    qkv = emb.reshape(N, S, HEADS, HEAD_DIM)
    corr = jnp.einsum("nqhd,nkhd->nhqk", qkv, qkv)
    mask4 = mask[:, :, None, :]                           # (N, 1, 1, K)
    corr = jnp.where(mask4 == 0.0, jnp.float32(-1e20), corr)
    att = jax.nn.softmax(corr / math.sqrt(float(EMBED)), axis=3)
    out = jnp.einsum("nhqk,nvhd->nqhd", att, qkv).reshape(N, S, EMBED)
    out = out @ params["fc_w"] + params["fc_b"][0]
    n1 = _layernorm(emb + out, params["ln1_g"][0], params["ln1_b"][0])
    ff = jnp.maximum(n1 @ params["w1"] + params["b1"][0], 0.0) @ params["w2"] + params["b2"][0]
    return _layernorm(n1 + ff, params["ln2_g"][0], params["ln2_b"][0])


if __name__ == "__main__":
    key = jax.random.PRNGKey(0)
    pkey, dkey = jax.random.split(key)
    params = init_params(pkey)
    p32, p128 = pack_params(params)

    token_ids = jax.random.randint(dkey, (BATCH, SEQ), 0, VOCAB, dtype=jnp.int32)
    mask_k = jnp.ones((BATCH, 1, SEQ), jnp.float32).at[1, 0, -2:].set(0.0)

    out = jax.block_until_ready(encoder_forward(token_ids, mask_k, p32, p128))
    ref = ref_forward(token_ids, mask_k, params)

    assert out.shape == (BATCH, SEQ, EMBED)
    max_err = float(jnp.max(jnp.abs(out - ref)))
    # Embedding / fc path runs at HIGHEST precision; remaining matmuls use the
    # default MXU precision (bf16 operand rounding), so a few e-3 element-wise
    # discrepancy vs. the f32 reference is expected.
    assert jnp.allclose(out, ref, atol=2e-2, rtol=2e-2), f"max abs err {max_err}"
    print("KERNEL_OK")
</pallas_src>

<mosaic_0001>
module attributes {stable_mosaic.version = 11 : i64} {
  func.func @encoder_kernel(%arg0: memref<16x1xi32, #tpu.memory_space<vmem>>, %arg1: memref<280x32xf32, #tpu.memory_space<vmem>>, %arg2: memref<33x128xf32, #tpu.memory_space<vmem>>, %arg3: memref<16x32xf32, #tpu.memory_space<vmem>>) attributes {dimension_semantics = [], scalar_prefetch = 0 : i64, scratch_operands = 0 : i64, tpu.core_type = #tpu.core_type<tc>} {
    %0 = tpu.iota {dimensions = array<i32: 1>} : vector<16x66xi32>
    %1 = tpu.iota {dimensions = array<i32: 0>} : vector<16x66xi32>
    %c0 = arith.constant 0 : index
    %c0_0 = arith.constant 0 : index
    %2 = vector.load %arg0[%c0, %c0_0] : memref<16x1xi32, #tpu.memory_space<vmem>>, vector<16x1xi32>
    %c7_i32 = arith.constant 7 : i32
    %3 = vector.broadcast %c7_i32 : i32 to vector<16x66xi32>
    %4 = arith.andi %1, %3 : vector<16x66xi32>
    %c50_i32 = arith.constant 50 : i32
    %5 = vector.broadcast %c50_i32 : i32 to vector<16x66xi32>
    %6 = arith.addi %5, %4 : vector<16x66xi32>
    %7 = vector.broadcast %2 : vector<16x1xi32> to vector<16x66xi32>
    %8 = arith.cmpi eq, %0, %7 : vector<16x66xi32>
    %9 = arith.cmpi eq, %0, %6 : vector<16x66xi32>
    %10 = arith.ori %8, %9 : vector<16x66xi1>
    %cst = arith.constant 1.000000e+00 : f32
    %cst_1 = arith.constant 0.000000e+00 : f32
    %11 = vector.broadcast %cst : f32 to vector<16x66xf32>
    %12 = vector.broadcast %cst_1 : f32 to vector<16x66xf32>
    %13 = arith.select %10, %11, %12 : vector<16x66xi1>, vector<16x66xf32>
    %c0_2 = arith.constant 0 : index
    %c0_3 = arith.constant 0 : index
    %14 = vector.load %arg1[%c0_2, %c0_3] : memref<280x32xf32, #tpu.memory_space<vmem>>, vector<66x32xf32>
    %c72 = arith.constant 72 : index
    %c0_4 = arith.constant 0 : index
    %15 = vector.load %arg1[%c72, %c0_4] : memref<280x32xf32, #tpu.memory_space<vmem>>, vector<66x32xf32>
    %cst_5 = arith.constant dense<0.000000e+00> : vector<16x32xf32>
    %16 = tpu.matmul %13, %14, %cst_5 {dimension_numbers = #tpu.dot_dimension_numbers<[1], [0], [0], [1], [0, 0, 1, 1], [], []>, precision = #tpu.contract_precision<fp32>} : vector<16x66xf32>, vector<66x32xf32>, vector<16x32xf32> -> vector<16x32xf32>
    %cst_6 = arith.constant dense<0.000000e+00> : vector<16x32xf32>
    %17 = tpu.matmul %13, %15, %cst_6 {dimension_numbers = #tpu.dot_dimension_numbers<[1], [0], [0], [1], [0, 0, 1, 1], [], []>, precision = #tpu.contract_precision<fp32>} : vector<16x66xf32>, vector<66x32xf32>, vector<16x32xf32> -> vector<16x32xf32>
    %18 = tpu.iota {dimensions = array<i32: 0>} : vector<16x16xi32>
    %19 = tpu.iota {dimensions = array<i32: 1>} : vector<16x16xi32>
    %c3_i32 = arith.constant 3 : i32
    %20 = vector.broadcast %c3_i32 : i32 to vector<16x16xi32>
    %21 = arith.shrsi %18, %20 : vector<16x16xi32>
    %c3_i32_7 = arith.constant 3 : i32
    %22 = vector.broadcast %c3_i32_7 : i32 to vector<16x16xi32>
    %23 = arith.shrsi %19, %22 : vector<16x16xi32>
    %24 = arith.cmpi eq, %21, %23 : vector<16x16xi32>
    %cst_8 = arith.constant 1.000000e+00 : f32
    %cst_9 = arith.constant 0.000000e+00 : f32
    %25 = vector.broadcast %cst_8 : f32 to vector<16x16xf32>
    %26 = vector.broadcast %cst_9 : f32 to vector<16x16xf32>
    %27 = arith.select %24, %25, %26 : vector<16x16xi1>, vector<16x16xf32>
    %c272 = arith.constant 272 : index
    %c0_10 = arith.constant 0 : index
    %28 = vector.load %arg1[%c272, %c0_10] : memref<280x32xf32, #tpu.memory_space<vmem>>, vector<1x32xf32>
    %cst_11 = arith.constant dense<0.000000e+00> : vector<16x32xf32>
    %29 = tpu.matmul %27, %17, %cst_11 {dimension_numbers = #tpu.dot_dimension_numbers<[1], [0], [0], [1], [0, 0, 1, 1], [], []>} : vector<16x16xf32>, vector<16x32xf32>, vector<16x32xf32> -> vector<16x32xf32>
    %30 = vector.broadcast %28 : vector<1x32xf32> to vector<16x32xf32>
    %31 = arith.addf %29, %30 : vector<16x32xf32>
    %c273 = arith.constant 273 : index
    %c0_12 = arith.constant 0 : index
    %32 = vector.load %arg1[%c273, %c0_12] : memref<280x32xf32, #tpu.memory_space<vmem>>, vector<1x32xf32>
    %c274 = arith.constant 274 : index
    %c0_13 = arith.constant 0 : index
    %33 = vector.load %arg1[%c274, %c0_13] : memref<280x32xf32, #tpu.memory_space<vmem>>, vector<1x32xf32>
    %34 = arith.addf %16, %31 : vector<16x32xf32>
    %cst_14 = arith.constant dense<0.000000e+00> : vector<16xf32>
    %35 = vector.multi_reduction <add>, %34, %cst_14 [1] : vector<16x32xf32> to vector<16xf32>
    %36 = vector.shape_cast %35 : vector<16xf32> to vector<16x1xf32>
    %cst_15 = arith.constant 3.200000e+01 : f32
    %37 = vector.broadcast %cst_15 : f32 to vector<16x1xf32>
    %38 = arith.divf %36, %37 : vector<16x1xf32>
    %39 = vector.broadcast %38 : vector<16x1xf32> to vector<16x32xf32>
    %40 = arith.subf %34, %39 : vector<16x32xf32>
    %41 = arith.mulf %40, %40 : vector<16x32xf32>
    %cst_16 = arith.constant dense<0.000000e+00> : vector<16xf32>
    %42 = vector.multi_reduction <add>, %41, %cst_16 [1] : vector<16x32xf32> to vector<16xf32>
    %43 = vector.shape_cast %42 : vector<16xf32> to vector<16x1xf32>
    %cst_17 = arith.constant 3.200000e+01 : f32
    %44 = vector.broadcast %cst_17 : f32 to vector<16x1xf32>
    %45 = arith.divf %43, %44 : vector<16x1xf32>
    %46 = vector.broadcast %38 : vector<16x1xf32> to vector<16x32xf32>
    %47 = arith.subf %34, %46 : vector<16x32xf32>
    %cst_18 = arith.constant 9.99999974E-6 : f32
    %48 = vector.broadcast %cst_18 : f32 to vector<16x1xf32>
    %49 = arith.addf %45, %48 : vector<16x1xf32>
    %50 = math.rsqrt %49 : vector<16x1xf32>
    %51 = vector.broadcast %50 : vector<16x1xf32> to vector<16x32xf32>
    %52 = arith.mulf %47, %51 : vector<16x32xf32>
    %53 = vector.broadcast %32 : vector<1x32xf32> to vector<16x32xf32>
    %54 = arith.mulf %52, %53 : vector<16x32xf32>
    %55 = vector.broadcast %33 : vector<1x32xf32> to vector<16x32xf32>
    %56 = arith.addf %54, %55 : vector<16x32xf32>
    %c0_19 = arith.constant 0 : index
    %c0_20 = arith.constant 0 : index
    %57 = vector.load %arg2[%c0_19, %c0_20] : memref<33x128xf32, #tpu.memory_space<vmem>>, vector<32x128xf32>
    %c32 = arith.constant 32 : index
    %c0_21 = arith.constant 0 : index
    %58 = vector.load %arg2[%c32, %c0_21] : memref<33x128xf32, #tpu.memory_space<vmem>>, vector<1x128xf32>
    %cst_22 = arith.constant dense<0.000000e+00> : vector<16x128xf32>
    %59 = tpu.matmul %56, %57, %cst_22 {dimension_numbers = #tpu.dot_dimension_numbers<[1], [0], [0], [1], [0, 0, 1, 1], [], []>} : vector<16x32xf32>, vector<32x128xf32>, vector<16x128xf32> -> vector<16x128xf32>
    %60 = vector.broadcast %58 : vector<1x128xf32> to vector<16x128xf32>
    %61 = arith.addf %59, %60 : vector<16x128xf32>
    %cst_23 = arith.constant 0.000000e+00 : f32
    %62 = vector.broadcast %cst_23 : f32 to vector<16x128xf32>
    %63 = arith.maximumf %61, %62 : vector<16x128xf32>
    %c144 = arith.constant 144 : index
    %c0_24 = arith.constant 0 : index
    %64 = vector.load %arg1[%c144, %c0_24] : memref<280x32xf32, #tpu.memory_space<vmem>>, vector<128x32xf32>
    %c275 = arith.constant 275 : index
    %c0_25 = arith.constant 0 : index
    %65 = vector.load %arg1[%c275, %c0_25] : memref<280x32xf32, #tpu.memory_space<vmem>>, vector<1x32xf32>
    %cst_26 = arith.constant dense<0.000000e+00> : vector<16x32xf32>
    %66 = tpu.matmul %63, %64, %cst_26 {dimension_numbers = #tpu.dot_dimension_numbers<[1], [0], [0], [1], [0, 0, 1, 1], [], []>} : vector<16x128xf32>, vector<128x32xf32>, vector<16x32xf32> -> vector<16x32xf32>
    %67 = vector.broadcast %65 : vector<1x32xf32> to vector<16x32xf32>
    %68 = arith.addf %66, %67 : vector<16x32xf32>
    %c276 = arith.constant 276 : index
    %c0_27 = arith.constant 0 : index
    %69 = vector.load %arg1[%c276, %c0_27] : memref<280x32xf32, #tpu.memory_space<vmem>>, vector<1x32xf32>
    %c277 = arith.constant 277 : index
    %c0_28 = arith.constant 0 : index
    %70 = vector.load %arg1[%c277, %c0_28] : memref<280x32xf32, #tpu.memory_space<vmem>>, vector<1x32xf32>
    %71 = arith.addf %56, %68 : vector<16x32xf32>
    %cst_29 = arith.constant dense<0.000000e+00> : vector<16xf32>
    %72 = vector.multi_reduction <add>, %71, %cst_29 [1] : vector<16x32xf32> to vector<16xf32>
    %73 = vector.shape_cast %72 : vector<16xf32> to vector<16x1xf32>
    %cst_30 = arith.constant 3.200000e+01 : f32
    %74 = vector.broadcast %cst_30 : f32 to vector<16x1xf32>
    %75 = arith.divf %73, %74 : vector<16x1xf32>
    %76 = vector.broadcast %75 : vector<16x1xf32> to vector<16x32xf32>
    %77 = arith.subf %71, %76 : vector<16x32xf32>
    %78 = arith.mulf %77, %77 : vector<16x32xf32>
    %cst_31 = arith.constant dense<0.000000e+00> : vector<16xf32>
    %79 = vector.multi_reduction <add>, %78, %cst_31 [1] : vector<16x32xf32> to vector<16xf32>
    %80 = vector.shape_cast %79 : vector<16xf32> to vector<16x1xf32>
    %cst_32 = arith.constant 3.200000e+01 : f32
    %81 = vector.broadcast %cst_32 : f32 to vector<16x1xf32>
    %82 = arith.divf %80, %81 : vector<16x1xf32>
    %83 = vector.broadcast %75 : vector<16x1xf32> to vector<16x32xf32>
    %84 = arith.subf %71, %83 : vector<16x32xf32>
    %cst_33 = arith.constant 9.99999974E-6 : f32
    %85 = vector.broadcast %cst_33 : f32 to vector<16x1xf32>
    %86 = arith.addf %82, %85 : vector<16x1xf32>
    %87 = math.rsqrt %86 : vector<16x1xf32>
    %88 = vector.broadcast %87 : vector<16x1xf32> to vector<16x32xf32>
    %89 = arith.mulf %84, %88 : vector<16x32xf32>
    %90 = vector.broadcast %69 : vector<1x32xf32> to vector<16x32xf32>
    %91 = arith.mulf %89, %90 : vector<16x32xf32>
    %92 = vector.broadcast %70 : vector<1x32xf32> to vector<16x32xf32>
    %93 = arith.addf %91, %92 : vector<16x32xf32>
    %c0_34 = arith.constant 0 : index
    %c0_35 = arith.constant 0 : index
    %94 = vector.load %arg3[%c0_34, %c0_35] : memref<16x32xf32, #tpu.memory_space<vmem>>, vector<16x32xf32>
    tpu.vector_store %arg3[%c0_34, %c0_35], %93 {strides = array<i32>} : memref<16x32xf32, #tpu.memory_space<vmem>>, vector<16x32xf32>,
    return
  }
}

</mosaic_0001>

<bundles_post_ra>
// kernel: encoder_forward.1
= control target key start
LH: loop header
LB: loop body
LE: loop exit
PB: predicated region body
PF: predicated region fallthrough
CT: control target
= control target key end

     0   :  { %v2428_v2 = vmov 0   ;;  %s2894_s0 = inlined_call_operand.vmem [shape: s32[16,1], index: 0, kind: input, shape index: {}]   ;;  %s2895_s1 = inlined_call_operand.vmem [shape: f32[280,32], index: 1, kind: input, shape index: {}]   ;;  %s2896_s2 = inlined_call_operand.vmem [shape: f32[33,128], index: 2, kind: input, shape index: {}]   ;;  %s2897_s3 = inlined_call_operand.hbm [shape: f32[16,32], index: 3, kind: output, shape index: {}]  }
   0x1   :  { %v20_v0 = vld [vmem:[%s2894_s0] sm:$0xff]  ;;  %v49_v1 = vld [vmem:[%s2895_s1 + $0x48] sm:$0xff]  ;;  %2395 = vset.pattern.permute.xlu0 %v2428_v2  ;;  %v50_v3 = vld [vmem:[%s2895_s1 + $0x50] sm:$0xff] }
   0x2   :  { %v70_v4 = vand.u32 4294901760, %v49_v1  ;;  %v51_v5 = vld [vmem:[%s2895_s1 + $0x58] sm:$0xff]  ;;  %v52_v6 = vld [vmem:[%s2895_s1 + $0x60] sm:$0xff]  ;;  %27 = vperm.xlu0 %2395, %v20_v0   ;;  %v73_v7 = vand.u32 4294901760, %v50_v3  ;;  %v53_v9 = vld [vmem:[%s2895_s1 + $0x68] sm:$0xff] }
   0x3   :  { %v76_v8 = vand.u32 4294901760, %v51_v5  ;;  %v54_v10 = vld [vmem:[%s2895_s1 + $0x70] sm:$0xff]  ;;  %v21_v11 = vld [vmem:[%s2894_s0 + $0x8] sm:$0xff]  ;;  %v79_v12 = vand.u32 4294901760, %v52_v6 }
   0x4   :  { %8 = vsyncpa [#allocation3], 0  ;;  %v2477_v13 = vpack.c.bf16 %v73_v7, %v70_v4  ;;  %v82_v14 = vand.u32 4294901760, %v53_v9  ;;  %v85_v15 = vand.u32 4294901760, %v54_v10  ;;  %v55_v17 = vld [vmem:[%s2895_s1 + $0x78] sm:$0xff]  ;;  %v56_v18 = vld [vmem:[%s2895_s1 + $0x80] sm:$0xff]  ;;  %v165_v19 = vsub.f32 %v49_v1, %v70_v4 }
   0x5   :  { %v2479_v16 = vpack.c.bf16 %v79_v12, %v76_v8  ;;  %v172_v20 = vsub.f32 %v50_v3, %v73_v7  ;;  %v88_v22 = vand.u32 4294901760, %v55_v17  ;;  %v91_v23 = vand.u32 4294901760, %v56_v18  ;;  %v57_v26 = vld [vmem:[%s2895_s1 + $0x88] sm:$0x3]  ;;  %s2430_s21 = smov [#allocation2]  }
   0x6   :  { %30 = vperm.xlu0 %2395, %v21_v11   ;;  %2131 = vmatprep.subr.bf16.mxu0 %v2477_v13  ;;  %v2490_v21 = vpack.c.bf16 %v85_v15, %v82_v14  ;;  %v166_v24 = vand.u32 4294901760, %v165_v19  ;;  %vm65_vm0 = vcmask 1041408   ;;  %v179_v31 = vsub.f32 %v51_v5, %v76_v8  ;;  %s1631_s22 = sshll.u32 %s2430_s21, 4  ;;  %s1632_s22 = int_to_ptr.vmem [resolvable:$true] %s1631_s22 }
   0x7   :  { %2133 = vmatpush3.bf16.msra.mxu0 %v2477_v13  ;;  %v173_v25 = vand.u32 4294901760, %v172_v20  ;;  %v2497_v29 = vpack.c.bf16 %v91_v23, %v88_v22  ;;  %v2500_v30 = vsel %vm65_vm0, %v57_v26, 0  ;;  %v186_v32 = vsub.f32 %v52_v6, %v79_v12  ;;  %s2404_s23 = scalar_lea.vmem %s1632_s22, 256  ;;  %p2409_p1 = scmp.lt.s32.totalorder %s1632_s22, %s1632_s22 }
   0x8   :  { %2135 = vmatprep.subr.bf16.mxu0 %v2479_v16  ;;  %v167_v27 = vsub.f32 %v165_v19, %v166_v24  ;;  %v180_v33 = vand.u32 4294901760, %v179_v31  ;;  %v2504_v35 = vand.u32 4294901760, %v2500_v30  ;;  %v193_v40 = vsub.f32 %v53_v9, %v82_v14  ;;  %p2405_p0 = scmp.ne.s32.totalorder %s1632_s22, %s2404_s23  ;;  %p2410_p2 = scmp.lt.s32.totalorder %s2404_s23, %s2404_s23 }
   0x9   :  { %v174_v28 = vsub.f32 %v172_v20, %v173_v25  ;;  %v187_v34 = vand.u32 4294901760, %v186_v32  ;;  %v200_v41 = vsub.f32 %v54_v10, %v85_v15  ;;  %v207_v50 = vsub.f32 %v55_v17, %v88_v22 }
   0xa   :  { %v168_v36 = vand.u32 4294901760, %v167_v27  ;;  %v181_v38 = vsub.f32 %v179_v31, %v180_v33  ;;  %v194_v44 = vand.u32 4294901760, %v193_v40  ;;  %v214_v51 = vsub.f32 %v56_v18, %v91_v23  ;;  %p2411_p3 = por %p2410_p2, %p2409_p1 }
   0xb   :  { %2137 = vmatpush3.bf16.msra.mxu0 %v2479_v16  ;;  %v175_v37 = vand.u32 4294901760, %v174_v28  ;;  %v188_v39 = vsub.f32 %v186_v32, %v187_v34  ;;  %v201_v45 = vand.u32 4294901760, %v200_v41  ;;  %v208_v54 = vand.u32 4294901760, %v207_v50 }
   0xc   :  { %2139 = vmatprep.subr.bf16.mxu0 %v2490_v21  ;;  %v182_v42 = vand.u32 4294901760, %v181_v38  ;;  %v195_v48 = vsub.f32 %v193_v40, %v194_v44  ;;  %v215_v55 = vand.u32 4294901760, %v214_v51  ;;  %v2162_v62 = vpack.c.bf16 %v172_v20, %v165_v19  ;;  %p2412_p4 = pnand %p2411_p3, %p2405_p0 }
   0xd   :  { %v189_v43 = vand.u32 4294901760, %v188_v39  ;;  %v2146_v46 = vpack.c.bf16 %v175_v37, %v168_v36  ;;  %v202_v49 = vsub.f32 %v200_v41, %v201_v45  ;;  %v209_v57 = vsub.f32 %v207_v50, %v208_v54  ;;  %v41_v39 = vld [vmem:[%s2895_s1 + $0x8] sm:$0xff] }
   0xe   :  { %v196_v52 = vand.u32 4294901760, %v195_v48  ;;  %v216_v58 = vsub.f32 %v214_v51, %v215_v55  ;;  %v2166_v63 = vpack.c.bf16 %v186_v32, %v179_v31  ;;  %v2170_v0 = vpack.c.bf16 %v200_v41, %v193_v40 }
   0xf   :  { %2141 = vmatpush3.bf16.msra.mxu0 %v2490_v21  ;;  %v2150_v47 = vpack.c.bf16 %v189_v43, %v182_v42  ;;  %v203_v53 = vand.u32 4294901760, %v202_v49  ;;  %v210_v59 = vand.u32 4294901760, %v209_v57  ;;  %v2174_v1 = vpack.c.bf16 %v214_v51, %v207_v50  ;;  %v47_v49 = vld [vmem:[%s2895_s1 + $0x38] sm:$0xff] }
  0x10   :  { %2143 = vmatprep.subr.bf16.mxu0 %v2497_v29  ;;  %v217_v60 = vand.u32 4294901760, %v216_v58  ;;  %v2510_v2 = vpack.c.bf16 %v173_v25, %v166_v24  ;;  %v2512_v3 = vpack.c.bf16 %v187_v34, %v180_v33  ;;  %v2514_v4 = vpack.c.bf16 %v201_v45, %v194_v44  ;;  %v45_v44 = vld [vmem:[%s2895_s1 + $0x28] sm:$0xff] }
  0x11   :  { %v2154_v56 = vpack.c.bf16 %v203_v53, %v196_v52  ;;  %v2516_v5 = vpack.c.bf16 %v215_v55, %v208_v54  ;;  %v15_v6 = vlaneseq  ;;  %vm58_vm3 = vcmask 539648   ;;  %v48_v52 = vld [vmem:[%s2895_s1 + $0x40] sm:$0x3] }
  0x12   :  { %v2158_v61 = vpack.c.bf16 %v217_v60, %v210_v59  ;;  %v2429_v17 = vmov 0.0   ;;  %v221_v34 = vsub.f32 %v2500_v30, %v2504_v35  ;;  %v40_v30 = vld [vmem:[%s2895_s1] sm:$0xff]  ;;  %v765_v41 = vand.u32 4294901760, %v41_v39 }
  0x13   :  { %2145 = vmatpush3.bf16.msra.mxu0 %v2497_v29  ;;  %v2518_v7 = vshrl.u32 %v15_v6, 7  ;;  %v2524_v10 = vand.u32 127, %v15_v6  ;;  %v762_v40 = vand.u32 4294901760, %v40_v30  ;;  %v777_v48 = vand.u32 4294901760, %v45_v44 }
  0x14   :  { %1841 = vmatprep.subr.mxu0 %v2504_v35  ;;  %v222_v36 = vand.u32 4294901760, %v221_v34  ;;  %v783_v51 = vand.u32 4294901760, %v47_v49  ;;  %v759_v54 = vsel %vm65_vm0, %v48_v52, 0  ;;  %vm674_vm9 = vcmask 130048  }
  0x15   :  { %v22_v8 = vand.u32 7, %v2518_v7  ;;  %v2522_v9 = vadd.s32 8, %v2518_v7  ;;  %v2622_v45 = vpack.c.bf16 %v765_v41, %v762_v40  ;;  %v2651_v55 = vand.u32 4294901760, %v759_v54 }
  0x16   :  { %v223_v37 = vsub.f32 %v221_v34, %v222_v36  ;;  %v664_v57 = vshra.s32 %v2524_v10, 3  ;;  %v2661_v59 = vsub.f32 %v40_v30, %v762_v40  ;;  %v2663_v60 = vsub.f32 %v41_v39, %v765_v41 }
  0x17   :  { %1842 = vmatpush3.msra.mxu0 %v2504_v35  ;;  %v24_v11 = vadd.s32 50, %v22_v8  ;;  %v23_v12 = vand.u32 7, %v2522_v9  ;;  %v2681_v6 = vsub.f32 %v45_v44, %v777_v48  ;;  %vm1354_vm11 = vcmask 261120  }
  0x18   :  { %2147 = vmatprep.subr.bf16.mxu0 %v2146_v46  ;;  %v224_v38 = vand.u32 4294901760, %v223_v37 }
  0x19   :  { %vm34_vm1 = vcmp.eq.s32.totalorder %v2524_v10, %v24_v11  ;;  %v25_v14 = vadd.s32 50, %v23_v12 }
  0x1b   :  { %vm35_vm5 = vcmp.eq.s32.totalorder %v2524_v10, %v25_v14 }
  0x81   :  { %v28_v15 = vpop.permute.xlu0 %27 }
  0x82   :  { %vm32_vm2 = vcmp.eq.s32.totalorder %v2524_v10, %v28_v15  ;;  %v893_v15 = vand.u32 4294901760, %v2681_v6 }
  0x83   :  { %vm36_vm4 = vmor %vm32_vm2, %vm34_vm1 }
  0x84   :  { %v2530_v18 = vsel %vm36_vm4, 1.0, %v2429_v17 }
  0x85   :  { %v31_v19 = vpop.permute.xlu0 %30  ;;  %v60_v20 = vsel %vm58_vm3, %v2530_v18, 0 }
  0x86   :  { %vm33_vm6 = vcmp.eq.s32.totalorder %v2524_v10, %v31_v19  ;;  %v2536_v22 = vsub.f32 %v60_v20, %v60_v20  ;;  %v2694_v20 = vsub.f32 %v47_v49, %v783_v51 }
  0x87   :  { %vm37_vm7 = vmor %vm33_vm6, %vm35_vm5 }
  0x88   :  { %v2539_v23 = vsel %vm37_vm7, 1.0, %v2429_v17  ;;  %v2542_v24 = vand.u32 4294901760, %v2536_v22 }
  0x89   :  { %v63_v25 = vsel %vm58_vm3, %v2539_v23, 0 }
  0x8a   :  { %v146_v26 = vsub.f32 %v2536_v22, %v2542_v24  ;;  %v2548_v27 = vsub.f32 %v63_v25, %v63_v25 }
  0x8c   :  { %v2550_v28 = vand.u32 4294901760, %v146_v26  ;;  %v2553_v31 = vand.u32 4294901760, %v2548_v27 }
  0x8e   :  { %1843 = vmatprep.mubr.f32.mxu0 %v2550_v28  ;;  %v156_v32 = vsub.f32 %v2548_v27, %v2553_v31 }
  0x90   :  { %v2558_v33 = vand.u32 4294901760, %v156_v32 }
  0x92   :  { %1844 = vmatmul.mubr.f32.vlgmr.msra.gmra.mrb[0].mxu0 %v2558_v33 }
  0x93   :  { %2149 = vmatpush3.bf16.msra.mxu0 %v2146_v46  ;;  %1864 = vmatprep.mubr.msk.f32.mxu0 %vm58_vm3, %v2530_v18 }
  0x94   :  { %2151 = vmatprep.subr.bf16.mxu0 %v2150_v47 }
  0x97   :  { %2153 = vmatpush3.bf16.msra.mxu0 %v2150_v47 }
  0x98   :  { %2155 = vmatprep.subr.bf16.mxu0 %v2154_v56 }
  0x9b   :  { %2157 = vmatpush3.bf16.msra.mxu0 %v2154_v56  ;;  %v662_v56 = vshra.s32 %v2518_v7, 3  ;;  %v663_v7 = vshra.s32 %v2522_v9, 3 }
  0x9c   :  { %2159 = vmatprep.subr.bf16.mxu0 %v2158_v61 }
  0x9d   :  { %vm665_vm8 = vcmp.eq.s32.totalorder %v662_v56, %v664_v57  ;;  %vm666_vm10 = vcmp.eq.s32.totalorder %v663_v7, %v664_v57 }
  0x9e   :  { %v667_v58 = vsel %vm665_vm8, 1.0, %v2429_v17  ;;  %v668_v30 = vsel %vm666_vm10, 1.0, %v2429_v17 }
  0x9f   :  { %2161 = vmatpush3.bf16.msra.mxu0 %v2158_v61  ;;  %1955 = vmatprep.mubr.msk.f32.mxu1 %vm674_vm9, %v667_v58  ;;  %v858_v61 = vand.u32 4294901760, %v2661_v59 }
  0xa0   :  { %1862 = vmatprep.subr.mxu0 %v224_v38 }
  0xa3   :  { %1863 = vmatpush3.msra.mxu0 %v224_v38  ;;  %v907_v38 = vand.u32 4294901760, %v2694_v20 }
  0xa4   :  { %1865 = vmatmul.mubr.msk.f32.vlgmr.msra.gmra.mrb[0].mxu0 %vm58_vm3, %v2539_v23  ;;  %2163 = vmatprep.subr.bf16.mxu0 %v2162_v62 }
  0xa5   :  { %2165 = vmatpush3.bf16.msra.mxu0 %v2162_v62  ;;  %1885 = vmatprep.mubr.f32.mxu0 %v2536_v22  ;;  %v865_v62 = vand.u32 4294901760, %v2663_v60  ;;  %v908_v41 = vsub.f32 %v2694_v20, %v907_v38 }
  0xa6   :  { %2167 = vmatprep.subr.bf16.mxu0 %v2166_v63 }
  0xa9   :  { %2169 = vmatpush3.bf16.msra.mxu0 %v2166_v63 }
  0xaa   :  { %2171 = vmatprep.subr.bf16.mxu0 %v2170_v0 }
  0xad   :  { %2173 = vmatpush3.bf16.msra.mxu0 %v2170_v0 }
  0xae   :  { %2175 = vmatprep.subr.bf16.mxu0 %v2174_v1 }
  0xb1   :  { %2177 = vmatpush3.bf16.msra.mxu0 %v2174_v1  ;;  %v859_v1 = vsub.f32 %v2661_v59, %v858_v61 }
  0xb2   :  { %1883 = vmatprep.subr.mxu0 %v221_v34 }
  0xb3   :  { %v860_v8 = vand.u32 4294901760, %v859_v1 }
  0xb5   :  { %1884 = vmatpush3.msra.mxu0 %v221_v34 }
  0xb6   :  { %1886 = vmatmul.mubr.f32.vlgmr.msra.gmra.mrb[0].mxu0 %v2548_v27  ;;  %2179 = vmatprep.subr.bf16.mxu0 %v2477_v13 }
  0xb7   :  { %2181 = vmatpush3.bf16.msra.mxu0 %v2477_v13  ;;  %1906 = vmatprep.mubr.f32.mxu0 %v2542_v24 }
  0xb8   :  { %2183 = vmatprep.subr.bf16.mxu0 %v2479_v16 }
  0xbb   :  { %2185 = vmatpush3.bf16.msra.mxu0 %v2479_v16 }
  0xbc   :  { %2187 = vmatprep.subr.bf16.mxu0 %v2490_v21 }
  0xbf   :  { %2189 = vmatpush3.bf16.msra.mxu0 %v2490_v21 }
  0xc0   :  { %2191 = vmatprep.subr.bf16.mxu0 %v2497_v29 }
  0xc3   :  { %2193 = vmatpush3.bf16.msra.mxu0 %v2497_v29 }
  0xc4   :  { %1904 = vmatprep.subr.mxu0 %v2504_v35 }
  0xc7   :  { %1905 = vmatpush3.msra.mxu0 %v2504_v35 }
  0xc8   :  { %1907 = vmatmul.mubr.f32.vlgmr.msra.gmra.mrb[0].mxu0 %v2553_v31  ;;  %2195 = vmatprep.subr.bf16.mxu0 %v2510_v2 }
  0xc9   :  { %2197 = vmatpush3.bf16.msra.mxu0 %v2510_v2  ;;  %1927 = vmatprep.mubr.msk.f32.mxu0 %vm58_vm3, %v2530_v18  ;;  %v866_v2 = vsub.f32 %v2663_v60, %v865_v62 }
  0xca   :  { %2199 = vmatprep.subr.bf16.mxu0 %v2512_v3 }
  0xcb   :  { %v867_v10 = vand.u32 4294901760, %v866_v2 }
  0xcd   :  { %2201 = vmatpush3.bf16.msra.mxu0 %v2512_v3  ;;  %v2246_v26 = vpack.c.bf16 %v867_v10, %v860_v8  ;;  %v1394_v10 = vld [vmem:[%s2896_s2] sm:$0xff] }
  0xce   :  { %2203 = vmatprep.subr.bf16.mxu0 %v2514_v4 }
  0xd1   :  { %2205 = vmatpush3.bf16.msra.mxu0 %v2514_v4 }
  0xd2   :  { %2207 = vmatprep.subr.bf16.mxu0 %v2516_v5 }
  0xd5   :  { %2209 = vmatpush3.bf16.msra.mxu0 %v2516_v5 }
  0xd6   :  { %1925 = vmatprep.subr.mxu0 %v222_v36 }
  0xd9   :  { %1926 = vmatpush3.msra.mxu0 %v222_v36  ;;  %v894_v36 = vsub.f32 %v2681_v6, %v893_v15 }
  0xda   :  { %1928 = vmatmul.mubr.msk.f32.vlgmr.msra.gmra.mrb[0].mxu0 %vm58_vm3, %v2539_v23  ;;  %2211 = vmatprep.subr.bf16.mxu0 %v2477_v13 }
  0xdb   :  { %2213 = vmatpush3.bf16.msra.mxu0 %v2477_v13  ;;  %1948 = vmatprep.mubr.msk.f32.mxu0 %vm58_vm3, %v2530_v18  ;;  %v42_v13 = vld [vmem:[%s2895_s1 + $0x10] sm:$0xff] }
  0xdc   :  { %2215 = vmatprep.subr.bf16.mxu0 %v2479_v16  ;;  %v768_v42 = vand.u32 4294901760, %v42_v13 }
  0xde   :  { %v2667_v63 = vsub.f32 %v42_v13, %v768_v42 }
  0xdf   :  { %2217 = vmatpush3.bf16.msra.mxu0 %v2479_v16  ;;  %v43_v16 = vld [vmem:[%s2895_s1 + $0x18] sm:$0xff] }
  0xe0   :  { %2219 = vmatprep.subr.bf16.mxu0 %v2490_v21  ;;  %v771_v43 = vand.u32 4294901760, %v43_v16  ;;  %v872_v3 = vand.u32 4294901760, %v2667_v63 }
  0xe2   :  { %v2624_v46 = vpack.c.bf16 %v771_v43, %v768_v42  ;;  %v2669_v0 = vsub.f32 %v43_v16, %v771_v43  ;;  %v873_v11 = vsub.f32 %v2667_v63, %v872_v3  ;;  %v895_v16 = vand.u32 4294901760, %v894_v36 }
  0xe3   :  { %2221 = vmatpush3.bf16.msra.mxu0 %v2490_v21  ;;  %v44_v21 = vld [vmem:[%s2895_s1 + $0x20] sm:$0xff]  ;;  %v913_v42 = vsub.f32 %v759_v54, %v2651_v55 }
  0xe4   :  { %2223 = vmatprep.subr.bf16.mxu0 %v2497_v29  ;;  %v774_v47 = vand.u32 4294901760, %v44_v21  ;;  %v879_v4 = vand.u32 4294901760, %v2669_v0  ;;  %v2266_v52 = vpack.c.bf16 %v2669_v0, %v2667_v63 }
  0xe5   :  { %v914_v44 = vand.u32 4294901760, %v913_v42 }
  0xe6   :  { %v2679_v5 = vsub.f32 %v44_v21, %v774_v47  ;;  %v880_v12 = vsub.f32 %v2669_v0, %v879_v4  ;;  %v909_v21 = vand.u32 4294901760, %v908_v41  ;;  %v1497_v41 = vld [vmem:[%s2895_s1 + $0xe8] sm:$0xff] }
  0xe7   :  { %2225 = vmatpush3.bf16.msra.mxu0 %v2497_v29  ;;  %v46_v29 = vld [vmem:[%s2895_s1 + $0x30] sm:$0xff] }
  0xe8   :  { %1946 = vmatprep.subr.mxu0 %v2504_v35  ;;  %v780_v50 = vand.u32 4294901760, %v46_v29  ;;  %v886_v14 = vand.u32 4294901760, %v2679_v5  ;;  %v881_v32 = vand.u32 4294901760, %v880_v12  ;;  %v2270_v54 = vpack.c.bf16 %v2681_v6, %v2679_v5 }
  0xea   :  { %v2646_v53 = vpack.c.bf16 %v783_v51, %v780_v50  ;;  %v2692_v19 = vsub.f32 %v46_v29, %v780_v50  ;;  %v2262_v51 = vpack.c.bf16 %v2663_v60, %v2661_v59 }
  0xeb   :  { %1947 = vmatpush3.msra.mxu0 %v2504_v35  ;;  %v2639_v35 = vpack.c.bf16 %v777_v48, %v774_v47  ;;  %v915_v48 = vsub.f32 %v913_v42, %v914_v44 }
  0xec   :  { %1949 = vmatmul.mubr.msk.f32.vlgmr.msra.gmra.mrb[0].mxu0 %vm58_vm3, %v2539_v23  ;;  %2231 = vmatprep.subr.bf16.mxu0 %v2622_v45  ;;  %v900_v37 = vand.u32 4294901760, %v2692_v19  ;;  %v2274_v56 = vpack.c.bf16 %v2694_v20, %v2692_v19  ;;  %v1486_v20 = vld [vmem:[%s2895_s1 + $0x90] sm:$0xff] }
  0xed   :  { %2233 = vmatpush3.bf16.msra.mxu0 %v2622_v45  ;;  %1976 = vmatprep.mubr.f32.mxu0 %v2550_v28  ;;  %v874_v28 = vand.u32 4294901760, %v873_v11  ;;  %v916_v49 = vand.u32 4294901760, %v915_v48  ;;  %v1395_v11 = vld [vmem:[%s2896_s2 + $0x8] sm:$0xff] }
  0xee   :  { %2235 = vmatprep.subr.bf16.mxu0 %v2624_v46  ;;  %v901_v40 = vsub.f32 %v2692_v19, %v900_v37  ;;  %v2306_v57 = vpack.c.bf16 %v907_v38, %v900_v37  ;;  %v2326_v12 = vpack.c.bf16 %v1395_v11, %v1394_v10  ;;  %v1492_v37 = vld [vmem:[%s2895_s1 + $0xc0] sm:$0xff]  ;;  %v1493_v38 = vld [vmem:[%s2895_s1 + $0xc8] sm:$0xff] }
  0xef   :  { %v2250_v39 = vpack.c.bf16 %v881_v32, %v874_v28  ;;  %v1489_v28 = vld [vmem:[%s2895_s1 + $0xa8] sm:$0xff] }
  0xf0   :  { %v902_v43 = vand.u32 4294901760, %v901_v40  ;;  %v1496_v40 = vld [vmem:[%s2895_s1 + $0xe0] sm:$0xff] }
  0xf1   :  { %2237 = vmatpush3.bf16.msra.mxu0 %v2624_v46 }
  0xf2   :  { %2239 = vmatprep.subr.bf16.mxu0 %v2639_v35  ;;  %v2258_v47 = vpack.c.bf16 %v909_v21, %v902_v43  ;;  %v1499_v43 = vld [vmem:[%s2895_s1 + $0xf8] sm:$0xff] }
  0xf5   :  { %2241 = vmatpush3.bf16.msra.mxu0 %v2639_v35 }
  0xf6   :  { %2243 = vmatprep.subr.bf16.mxu0 %v2646_v53 }
  0xf9   :  { %2245 = vmatpush3.bf16.msra.mxu0 %v2646_v53 }
  0xfa   :  { %1974 = vmatprep.subr.mxu0 %v2651_v55 }
  0xfd   :  { %1975 = vmatpush3.msra.mxu0 %v2651_v55 }
  0xfe   :  { %1977 = vmatmul.mubr.f32.vlgmr.msra.gmra.mrb[2].mxu0 %v2558_v33  ;;  %v887_v33 = vsub.f32 %v2679_v5, %v886_v14  ;;  %2327 = vmatprep.subr.bf16.mxu0 %v2326_v12 }
  0xff   :  { %2329 = vmatpush3.bf16.msra.mxu0 %v2326_v12 }
 0x100   :  { %v888_v13 = vand.u32 4294901760, %v887_v33  ;;  %v1490_v33 = vld [vmem:[%s2895_s1 + $0xb0] sm:$0xff] }
 0x102   :  { %v2254_v17 = vpack.c.bf16 %v895_v16, %v888_v13  ;;  %v1495_v13 = vld [vmem:[%s2895_s1 + $0xd8] sm:$0xff] }
 0x1bf   :  { %v1950_v25 = vpop.f32.mrb[0].mxu0 }
 0x1c0   :  { %v652_v9 = vpop.f32.mrb[1].mxu0 }
 0x1c1   :  { %v2226_v34 = vpack.c.bf16 %v1950_v25, %v652_v9  ;;  %v1487_v25 = vld [vmem:[%s2895_s1 + $0x98] sm:$0xff]  ;;  %v1488_v9 = vld [vmem:[%s2895_s1 + $0xa0] sm:$0xff] }
 0x1c2   :  { %v2338_v32 = vpack.c.bf16 %v1489_v28, %v1488_v9 }
 0x1c3   :  { %2227 = vmatprep.subr.bf16.mxu1 %v2226_v34 }
 0x1c4   :  { %2229 = vmatpush3.bf16.msra.mxu1 %v2226_v34  ;;  %v1491_v34 = vld [vmem:[%s2895_s1 + $0xb8] sm:$0xff] }
 0x1c5   :  { %2247 = vmatprep.subr.bf16.mxu1 %v2246_v26  ;;  %v2342_v36 = vpack.c.bf16 %v1491_v34, %v1490_v33 }
 0x1c7   :  { %1956 = vmatmul.mubr.msk.f32.vlgmr.msra.gmra.mrb[0].mxu1 %vm674_vm9, %v668_v30  ;;  %v2346_v30 = vpack.c.bf16 %v1493_v38, %v1492_v37  ;;  %v1663_v37 = vld [vmem:[%s2895_s1 + $0x114] ss:$0 sm:$0xff] }
 0x1c8   :  { %2249 = vmatpush3.bf16.msra.mxu1 %v2246_v26  ;;  %1997 = vmatprep.mubr.msk.f32.mxu1 %vm58_vm3, %v2530_v18  ;;  %v2334_v26 = vpack.c.bf16 %v1487_v25, %v1486_v20 }
 0x1c9   :  { %2251 = vmatprep.subr.bf16.mxu1 %v2250_v39 }
 0x1cc   :  { %2253 = vmatpush3.bf16.msra.mxu1 %v2250_v39  ;;  %v1494_v39 = vld [vmem:[%s2895_s1 + $0xd0] sm:$0xff] }
 0x1cd   :  { %2255 = vmatprep.subr.bf16.mxu1 %v2254_v17  ;;  %v2350_v16 = vpack.c.bf16 %v1495_v13, %v1494_v39 }
 0x1d0   :  { %2257 = vmatpush3.bf16.msra.mxu1 %v2254_v17  ;;  %v1498_v17 = vld [vmem:[%s2895_s1 + $0xf0] sm:$0xff] }
 0x1d1   :  { %v2715_v29 = vpop.f32.mrb[2].mxu0  ;;  %2259 = vmatprep.subr.bf16.mxu1 %v2258_v47  ;;  %v2358_v21 = vpack.c.bf16 %v1499_v43, %v1498_v17 }
 0x1d2   :  { %v2717_v50 = vpop.f32.mrb[3].mxu0 }
 0x1d4   :  { %2261 = vmatpush3.bf16.msra.mxu1 %v2258_v47 }
 0x1d5   :  { %1995 = vmatprep.subr.mxu1 %v916_v49 }
 0x1d8   :  { %1996 = vmatpush3.msra.mxu1 %v916_v49 }
 0x1d9   :  { %1998 = vmatmul.mubr.msk.f32.vlgmr.msra.gmra.mrb[2].mxu1 %vm58_vm3, %v2539_v23  ;;  %2263 = vmatprep.subr.bf16.mxu1 %v2262_v51 }
 0x1da   :  { %2265 = vmatpush3.bf16.msra.mxu1 %v2262_v51  ;;  %2018 = vmatprep.mubr.f32.mxu1 %v2536_v22  ;;  %v2294_v22 = vpack.c.bf16 %v865_v62, %v858_v61 }
 0x1db   :  { %2267 = vmatprep.subr.bf16.mxu1 %v2266_v52 }
 0x1de   :  { %2269 = vmatpush3.bf16.msra.mxu1 %v2266_v52  ;;  %v1657_v52 = vld [vmem:[%s2895_s1 + $0x111] ss:$0 sm:$0xff] }
 0x1df   :  { %2271 = vmatprep.subr.bf16.mxu1 %v2270_v54 }
 0x1e2   :  { %2273 = vmatpush3.bf16.msra.mxu1 %v2270_v54 }
 0x1e3   :  { %2275 = vmatprep.subr.bf16.mxu1 %v2274_v56 }
 0x1e6   :  { %2277 = vmatpush3.bf16.msra.mxu1 %v2274_v56  ;;  %v1658_v56 = vld [vmem:[%s2895_s1 + $0x112] ss:$0 sm:$0xff] }
 0x1e7   :  { %2016 = vmatprep.subr.mxu1 %v913_v42 }
 0x1ea   :  { %2017 = vmatpush3.msra.mxu1 %v913_v42  ;;  %v2354_v42 = vpack.c.bf16 %v1497_v41, %v1496_v40 }
 0x1eb   :  { %2019 = vmatmul.mubr.f32.vlgmr.msra.gmra.mrb[2].mxu1 %v2548_v27  ;;  %2279 = vmatprep.subr.bf16.mxu1 %v2622_v45  ;;  %v2302_v27 = vpack.c.bf16 %v893_v15, %v886_v14  ;;  %v1396_v14 = vld [vmem:[%s2896_s2 + $0x10] sm:$0xff]  ;;  %v1397_v15 = vld [vmem:[%s2896_s2 + $0x18] sm:$0xff] }
 0x1ec   :  { %2281 = vmatpush3.bf16.msra.mxu1 %v2622_v45  ;;  %2039 = vmatprep.mubr.f32.mxu1 %v2542_v24  ;;  %v2298_v24 = vpack.c.bf16 %v879_v4, %v872_v3  ;;  %v2330_v19 = vpack.c.bf16 %v1397_v15, %v1396_v14 }
 0x1ed   :  { %2283 = vmatprep.subr.bf16.mxu1 %v2624_v46 }
 0x1ee   :  { %2331 = vmatprep.subr.bf16.mxu0 %v2330_v19 }
 0x1ef   :  { %2333 = vmatpush3.bf16.msra.mxu0 %v2330_v19 }
 0x1f0   :  { %2285 = vmatpush3.bf16.msra.mxu1 %v2624_v46 }
 0x1f1   :  { %2287 = vmatprep.subr.bf16.mxu1 %v2639_v35 }
 0x1f4   :  { %2289 = vmatpush3.bf16.msra.mxu1 %v2639_v35 }
 0x1f5   :  { %2291 = vmatprep.subr.bf16.mxu1 %v2646_v53 }
 0x1f8   :  { %2293 = vmatpush3.bf16.msra.mxu1 %v2646_v53 }
 0x1f9   :  { %2037 = vmatprep.subr.mxu1 %v2651_v55 }
 0x1fc   :  { %2038 = vmatpush3.msra.mxu1 %v2651_v55 }
 0x1fd   :  { %2040 = vmatmul.mubr.f32.vlgmr.msra.gmra.mrb[2].mxu1 %v2553_v31  ;;  %2295 = vmatprep.subr.bf16.mxu1 %v2294_v22 }
 0x1fe   :  { %2297 = vmatpush3.bf16.msra.mxu1 %v2294_v22  ;;  %2060 = vmatprep.mubr.msk.f32.mxu1 %vm58_vm3, %v2530_v18 }
 0x1ff   :  { %2299 = vmatprep.subr.bf16.mxu1 %v2298_v24 }
 0x202   :  { %2301 = vmatpush3.bf16.msra.mxu1 %v2298_v24 }
 0x203   :  { %2303 = vmatprep.subr.bf16.mxu1 %v2302_v27 }
 0x206   :  { %2305 = vmatpush3.bf16.msra.mxu1 %v2302_v27 }
 0x207   :  { %2307 = vmatprep.subr.bf16.mxu1 %v2306_v57 }
 0x20a   :  { %2309 = vmatpush3.bf16.msra.mxu1 %v2306_v57 }
 0x20b   :  { %2058 = vmatprep.subr.mxu1 %v914_v44 }
 0x20e   :  { %2059 = vmatpush3.msra.mxu1 %v914_v44 }
 0x20f   :  { %2061 = vmatmul.mubr.msk.f32.vlgmr.msra.gmra.mrb[2].mxu1 %vm58_vm3, %v2539_v23  ;;  %2311 = vmatprep.subr.bf16.mxu1 %v2622_v45 }
 0x210   :  { %2313 = vmatpush3.bf16.msra.mxu1 %v2622_v45  ;;  %2081 = vmatprep.mubr.msk.f32.mxu1 %vm58_vm3, %v2530_v18  ;;  %v1648_v18 = vld [vmem:[%s2895_s1 + $0x110] ss:$0 sm:$0xff] }
 0x211   :  { %2315 = vmatprep.subr.bf16.mxu1 %v2624_v46 }
 0x214   :  { %2317 = vmatpush3.bf16.msra.mxu1 %v2624_v46 }
 0x215   :  { %2319 = vmatprep.subr.bf16.mxu1 %v2639_v35 }
 0x218   :  { %2321 = vmatpush3.bf16.msra.mxu1 %v2639_v35 }
 0x219   :  { %2323 = vmatprep.subr.bf16.mxu1 %v2646_v53 }
 0x21c   :  { %2325 = vmatpush3.bf16.msra.mxu1 %v2646_v53 }
 0x21d   :  { %2079 = vmatprep.subr.mxu1 %v2651_v55 }
 0x220   :  { %2080 = vmatpush3.msra.mxu1 %v2651_v55 }
 0x221   :  { %2082 = vmatmul.mubr.msk.f32.vlgmr.msra.gmra.mrb[2].mxu1 %vm58_vm3, %v2539_v23  ;;  %2335 = vmatprep.subr.bf16.mxu1 %v2334_v26 }
 0x222   :  { %2337 = vmatpush3.bf16.msra.mxu1 %v2334_v26 }
 0x223   :  { %2339 = vmatprep.subr.bf16.mxu1 %v2338_v32 }
 0x226   :  { %2341 = vmatpush3.bf16.msra.mxu1 %v2338_v32 }
 0x227   :  { %2343 = vmatprep.subr.bf16.mxu1 %v2342_v36 }
 0x22a   :  { %2345 = vmatpush3.bf16.msra.mxu1 %v2342_v36 }
 0x22b   :  { %2347 = vmatprep.subr.bf16.mxu1 %v2346_v30 }
 0x22e   :  { %2349 = vmatpush3.bf16.msra.mxu1 %v2346_v30  ;;  %v1664_v30 = vld [vmem:[%s2895_s1 + $0x115] ss:$0 sm:$0xff] }
 0x22f   :  { %2351 = vmatprep.subr.bf16.mxu1 %v2350_v16 }
 0x232   :  { %2353 = vmatpush3.bf16.msra.mxu1 %v2350_v16 }
 0x233   :  { %2355 = vmatprep.subr.bf16.mxu1 %v2354_v42 }
 0x236   :  { %2357 = vmatpush3.bf16.msra.mxu1 %v2354_v42 }
 0x237   :  { %2359 = vmatprep.subr.bf16.mxu1 %v2358_v21 }
 0x23a   :  { %2361 = vmatpush3.bf16.msra.mxu1 %v2358_v21 }
 0x29a   :  { %v1957_v31 = vpop.f32.mrb[0].mxu1 }
 0x29b   :  { %v753_v45 = vadd.f32 %v1957_v31, %v1648_v18  ;;  %v747_v46 = vpop.f32.mrb[1].mxu1 }
 0x29c   :  { %v748_v58 = vadd.f32 %v1648_v18, %v747_v46  ;;  %v1501_v46 = vld [vmem:[%s2895_s1 + $0x108] sm:$0xff] }
 0x29d   :  { %v852_v35 = vadd.f32 %v2715_v29, %v753_v45  ;;  %v1500_v45 = vld [vmem:[%s2895_s1 + $0x100] sm:$0xff] }
 0x29e   :  { %v842_v59 = vadd.f32 %v2717_v50, %v748_v58  ;;  %v2362_v58 = vpack.c.bf16 %v1501_v46, %v1500_v45 }
 0x2a0   :  { %2363 = vmatprep.subr.bf16.mxu1 %v2362_v58 }
 0x2a1   :  { %2365 = vmatpush3.bf16.msra.mxu1 %v2362_v58 }
 0x2f4   :  { %v2083_v53 = vpop.f32.mrb[2].mxu1 }
 0x2f5   :  { %v2368_v60 = vadd.f32 %v2083_v53, %v852_v35  ;;  %v1344_v61 = vpop.f32.mrb[3].mxu1  ;;  %v1659_v35 = vld [vmem:[%s2896_s2 + $0x20] ss:$0 sm:$0xff] }
 0x2f6   :  { %v2371_v55 = vadd.f32 %v1344_v61, %v842_v59 }
 0x2f7   :  { %v1358_v23 = vsel %vm1354_vm11, %v2368_v60, 0.0 }
 0x2f8   :  { %v1355_v62 = vsel %vm1354_vm11, %v2371_v55, 0.0 }
 0x2f9   :  { %1356 = vadd.xlane.f32.xlu1 %v1355_v62 }
 0x2fd   :  { %1359 = vadd.xlane.f32.xlu1 %v1358_v23  ;;  %v1662_v23 = vld [vmem:[%s2895_s1 + $0x113] ss:$0 sm:$0xff] }
 0x386   :  { %v1357_v63 = vpop.xlane.xlu1 %1356 }
 0x387   :  { %v1362_v0 = vmul.f32 0.03125, %v1357_v63 }
 0x389   :  { %v2784_v1 = vsub.f32 %v2371_v55, %v1362_v0 }
 0x38a   :  { %v1360_v2 = vpop.xlane.xlu1 %1359 }
 0x38b   :  { %v1363_v3 = vmul.f32 0.03125, %v1360_v2  ;;  %v1366_v4 = vmul.f32 %v2784_v1, %v2784_v1 }
 0x38d   :  { %v2788_v5 = vsub.f32 %v2368_v60, %v1363_v3  ;;  %v1368_v6 = vsel %vm1354_vm11, %v1366_v4, 0.0 }
 0x38e   :  { %1369 = vadd.xlane.f32.xlu0 %v1368_v6 }
 0x38f   :  { %v1367_v7 = vmul.f32 %v2788_v5, %v2788_v5 }
 0x391   :  { %v1371_v8 = vsel %vm1354_vm11, %v1367_v7, 0.0 }
 0x392   :  { %1372 = vadd.xlane.f32.xlu1 %v1371_v8 }
 0x41b   :  { %v1370_v44 = vpop.xlane.xlu0 %1369 }
 0x41c   :  { %v1374_v47 = vmul.f32 0.03125, %v1370_v44 }
 0x41e   :  { %v1376_v48 = vadd.f32 1e-05, %v1374_v47 }
 0x41f   :  { %v1373_v29 = vpop.xlane.xlu1 %1372 }
 0x420   :  { %2396 = vrsqrt.f32 %v1376_v48  ;;  %v1375_v49 = vmul.f32 0.03125, %v1373_v29 }
 0x422   :  { %v1377_v50 = vadd.f32 1e-05, %v1375_v49 }
 0x424   :  { %2398 = vrsqrt.f32 %v1377_v50 }
 0x42a   :  { %v2397_v51 = vpop.eup %2396 }
 0x42b   :  { %v1380_v54 = vmul.f32 %v2397_v51, %v2784_v1 }
 0x42d   :  { %v1386_v22 = vmul.f32 %v1657_v52, %v1380_v54 }
 0x42e   :  { %v2399_v24 = vpop.eup %2398 }
 0x42f   :  { %v1381_v27 = vmul.f32 %v2399_v24, %v2788_v5  ;;  %v1392_v57 = vadd.f32 %v1658_v56, %v1386_v22 }
 0x431   :  { %v1387_v18 = vmul.f32 %v1657_v52, %v1381_v27  ;;  %2092 = vmatprep.mubr.msk.f32.mxu0 %vm1354_vm11, %v1392_v57 }
 0x433   :  { %v1393_v31 = vadd.f32 %v1658_v56, %v1387_v18 }
 0x435   :  { %2093 = vmatmul.mubr.msk.f32.vlgmr.msra.gmra.mrb[4].mxu0 %vm1354_vm11, %v1393_v31 }
 0x508   :  { %v2094_v59 = vpop.f32.mrb[4].mxu0 }
 0x509   :  { %v1481_v53 = vadd.f32 %v2094_v59, %v1659_v35  ;;  %v1475_v60 = vpop.f32.mrb[5].mxu0 }
 0x50a   :  { %v1476_v61 = vadd.f32 %v1659_v35, %v1475_v60 }
 0x50b   :  { %v1485_v62 = vmax.f32 %v1481_v53, 0.0 }
 0x50c   :  { %v1484_v55 = vmax.f32 %v1476_v61, 0.0 }
 0x50e   :  { %2127 = vmatprep.mubr.f32.mxu1 %v1484_v55 }
 0x50f   :  { %2128 = vmatmul.mubr.f32.vlgmr.msra.gmra.mrb[4].mxu1 %v1485_v62 }
 0x5e2   :  { %v2129_v63 = vpop.f32.mrb[4].mxu1 }
 0x5e3   :  { %v1573_v0 = vpop.f32.mrb[5].mxu1  ;;  %v1579_v1 = vadd.f32 %v2129_v63, %v1662_v23 }
 0x5e4   :  { %v1574_v2 = vadd.f32 %v1662_v23, %v1573_v0 }
 0x5e5   :  { %v1585_v5 = vadd.f32 %v1579_v1, %v1393_v31 }
 0x5e6   :  { %v1584_v3 = vadd.f32 %v1574_v2, %v1392_v57 }
 0x5e7   :  { %v1589_v6 = vsel %vm1354_vm11, %v1585_v5, 0.0 }
 0x5e8   :  { %v1586_v4 = vsel %vm1354_vm11, %v1584_v3, 0.0 }
 0x5e9   :  { %1587 = vadd.xlane.f32.xlu1 %v1586_v4 }
 0x5ed   :  { %1590 = vadd.xlane.f32.xlu1 %v1589_v6 }
 0x676   :  { %v1588_v7 = vpop.xlane.xlu1 %1587 }
 0x677   :  { %v1592_v8 = vmul.f32 0.03125, %v1588_v7 }
 0x679   :  { %v1594_v10 = vsub.f32 %v1584_v3, %v1592_v8 }
 0x67a   :  { %v1591_v11 = vpop.xlane.xlu1 %1590 }
 0x67b   :  { %v1593_v12 = vmul.f32 0.03125, %v1591_v11  ;;  %v1596_v14 = vmul.f32 %v1594_v10, %v1594_v10 }
 0x67d   :  { %v1595_v15 = vsub.f32 %v1585_v5, %v1593_v12  ;;  %v1598_v19 = vsel %vm1354_vm11, %v1596_v14, 0.0 }
 0x67e   :  { %1599 = vadd.xlane.f32.xlu1 %v1598_v19 }
 0x67f   :  { %v1597_v20 = vmul.f32 %v1595_v15, %v1595_v15 }
 0x681   :  { %v1601_v25 = vsel %vm1354_vm11, %v1597_v20, 0.0 }
 0x682   :  { %1602 = vadd.xlane.f32.xlu1 %v1601_v25 }
 0x70b   :  { %v1600_v9 = vpop.xlane.xlu1 %1599 }
 0x70c   :  { %v1604_v26 = vmul.f32 0.03125, %v1600_v9 }
 0x70e   :  { %v1606_v28 = vadd.f32 1e-05, %v1604_v26 }
 0x70f   :  { %v1603_v32 = vpop.xlane.xlu1 %1602 }
 0x710   :  { %2400 = vrsqrt.f32 %v1606_v28  ;;  %v1605_v33 = vmul.f32 0.03125, %v1603_v32 }
 0x712   :  { %v1607_v34 = vadd.f32 1e-05, %v1605_v33 }
 0x714   :  { %2402 = vrsqrt.f32 %v1607_v34 }
 0x71a   :  { %v2401_v36 = vpop.eup %2400 }
 0x71b   :  { %v1610_v38 = vmul.f32 %v2401_v36, %v1594_v10 }
 0x71d   :  { %v1616_v39 = vmul.f32 %v1663_v37, %v1610_v38 }
 0x71e   :  { %v2403_v13 = vpop.eup %2402 }
 0x71f   :  { %v1611_v16 = vmul.f32 %v2403_v13, %v1595_v15  ;;  %v1622_v40 = vadd.f32 %v1664_v30, %v1616_v39 }
 0x721   :  { %v1617_v41 = vmul.f32 %v1663_v37, %v1611_v16  ;;  %1624 = vst.msk [vmem:[#allocation2] sm:$0xff] %vm1354_vm11, %v1622_v40 }
 0x723   :  { %v1623_v42 = vadd.f32 %v1664_v30, %v1617_v41 }
 0x725   :  { %1625 = vst.msk [vmem:[#allocation2 + $0x8] sm:$0xff] %vm1354_vm11, %v1623_v42 }
 0x726   :  { %2415 = shalt.err (!%p2412_p4)
}
 0x727   :  { %s2416_s25 = scalar_lea.hbm %s2897_s3, 256 }
 0x728   :  { %p2417_p5 = scmp.ne.s32.totalorder %s2897_s3, %s2416_s25  ;;  %p2420_p6 = scmp.lt.u32.totalorder %s2416_s25, %s2897_s3 }
 0x72a   :  { %p2422_p7 = pnand %p2420_p6, %p2417_p5 }
 0x72c   :  { %2425 = shalt.err (!%p2422_p7)
}
 0x72d   :  { %s2431_s30 = smov 128   ;;  %s2432_s4 = smov 8  }
 0x72e   :  { %1637 = dma.vmem_to_hbm [thread:$0]  %s1632_s22, 256, %s2897_s3, [#allocation3], %s2431_s30, %s2431_s30, %s2432_s4  }
 0x72f   :  { %2426 = dma.done.wait [#allocation3], 256  }
 0x730   :  { %2427 = vsyncadd [#allocation3], 4294967040 }
 0x731   :  { %1641 = vsyncpa [#allocation3], 1 }

</bundles_post_ra>
